<compile_context>
chip_gen: v7x
topology: tpu7x:2x2x1
jax: 0.10.0
libtpu: 0.0.40
codegen_flags: <defaults>
</compile_context>

<pallas_src>
import math
import functools

import jax
import jax.numpy as jnp
from jax import lax
from jax.experimental import pallas as pl
from jax.experimental.pallas import tpu as pltpu


_MiB = 1024 * 1024


def _round_up(n, m):
    return -(-n // m) * m


def _vmem_limit(est_bytes):
    # At least the scoped default, at most the smallest physical VMEM (64 MiB on v7x).
    return int(min(64 * _MiB, max(32 * _MiB, 2 * est_bytes)))


# ---------------------------------------------------------------------------
# Tiled linear:  y = x @ W^T + b   (bf16 MXU operands, f32 accumulation)
# ---------------------------------------------------------------------------

def _linear_kernel(x_ref, w_ref, b_ref, o_ref):
    # x: (tm, D_in), w: (D_in, tn), b: (1, tn), o: (tm, tn)
    x = x_ref[...].astype(jnp.bfloat16)
    w = w_ref[...].astype(jnp.bfloat16)
    acc = jnp.dot(x, w, preferred_element_type=jnp.float32)
    o_ref[...] = (acc + b_ref[...].astype(jnp.float32)).astype(o_ref.dtype)


def pallas_linear(x, w_t, b, *, out_dtype=None, tm=512, tn=512):
    """x: (N, D_in), w_t: (D_in, D_out) (= W^T), b: (D_out,) -> (N, D_out)."""
    N, D_in = x.shape
    D_out = w_t.shape[1]
    out_dtype = x.dtype if out_dtype is None else out_dtype
    tm = min(tm, N)
    tn = min(tn, D_out)
    grid = (pl.cdiv(N, tm), pl.cdiv(D_out, tn))

    est = (2 * (tm * D_in * x.dtype.itemsize + D_in * tn * w_t.dtype.itemsize)
           + 2 * tm * tn * 4 + 2 * tn * 4)
    return pl.pallas_call(
        _linear_kernel,
        out_shape=jax.ShapeDtypeStruct((N, D_out), out_dtype),
        grid=grid,
        in_specs=[
            pl.BlockSpec((tm, D_in), lambda i, j: (i, 0)),
            pl.BlockSpec((D_in, tn), lambda i, j: (0, j)),
            pl.BlockSpec((1, tn), lambda i, j: (0, j)),
        ],
        out_specs=pl.BlockSpec((tm, tn), lambda i, j: (i, j)),
        compiler_params=pltpu.CompilerParams(
            dimension_semantics=("parallel", "parallel"),
            vmem_limit_bytes=_vmem_limit(est)),
        cost_estimate=pl.CostEstimate(
            flops=2 * N * D_in * D_out,
            transcendentals=0,
            bytes_accessed=(N * D_in * x.dtype.itemsize
                            + D_in * D_out * w_t.dtype.itemsize
                            + N * D_out * jnp.dtype(out_dtype).itemsize
                            + D_out * b.dtype.itemsize)),
    )(x, w_t, b.reshape(1, D_out))


# ---------------------------------------------------------------------------
# Fused K/V/Q projection (self-attention path).
#   One pallas_call, stacked weights (3, D, D) -> output (3, N, D).
#   Projection axis innermost in the grid so the activation tile's block index
#   never changes across it -> the activations are DMA'd from HBM exactly once.
# ---------------------------------------------------------------------------

def pallas_fused_qkv(x, w3_t, b3, *, out_dtype=None, tm=512, tn=512):
    """x: (N, D_in), w3_t: (3, D_in, D_out), b3: (3, D_out) -> (3, N, D_out)."""
    N, D_in = x.shape
    D_out = w3_t.shape[-1]
    out_dtype = x.dtype if out_dtype is None else out_dtype
    tm = min(tm, N)
    tn = min(tn, D_out)
    grid = (pl.cdiv(N, tm), pl.cdiv(D_out, tn), 3)

    est = (2 * (tm * D_in * x.dtype.itemsize + D_in * tn * w3_t.dtype.itemsize)
           + 2 * tm * tn * 4 + 2 * tn * 4)
    return pl.pallas_call(
        _linear_kernel,   # same body: squeezed leading dims give identical views
        out_shape=jax.ShapeDtypeStruct((3, N, D_out), out_dtype),
        grid=grid,
        in_specs=[
            pl.BlockSpec((tm, D_in), lambda i, j, p: (i, 0)),
            pl.BlockSpec((None, D_in, tn), lambda i, j, p: (p, 0, j)),
            pl.BlockSpec((None, 1, tn), lambda i, j, p: (p, 0, j)),
        ],
        out_specs=pl.BlockSpec((None, tm, tn), lambda i, j, p: (p, i, j)),
        compiler_params=pltpu.CompilerParams(
            dimension_semantics=("parallel", "parallel", "arbitrary"),
            vmem_limit_bytes=_vmem_limit(est)),
        cost_estimate=pl.CostEstimate(
            flops=2 * 3 * N * D_in * D_out,
            transcendentals=0,
            bytes_accessed=(N * D_in * x.dtype.itemsize
                            + 3 * D_in * D_out * w3_t.dtype.itemsize
                            + 3 * N * D_out * jnp.dtype(out_dtype).itemsize)),
    )(x, w3_t, b3.reshape(3, 1, D_out))


# ---------------------------------------------------------------------------
# Flash-style attention on (B, S, D) layout (no head transposes in HBM).
#   grid = (B, q-tiles, kv-tiles); kv innermost / "arbitrary".
#   Running max / denom / unnormalized accumulator per head in VMEM scratch.
# ---------------------------------------------------------------------------

def _flash_attn_kernel(k_ref, v_ref, q_ref, o_ref, m_sc, l_sc, acc_sc,
                       *, n_head, dk, scale, kv_len):
    # k/v: (tk, D) bf16, q: (tq, D) bf16, o: (tq, D)
    kv = pl.program_id(2)
    tk = k_ref.shape[-2]

    @pl.when(kv == 0)
    def _init():
        m_sc[...] = jnp.full(m_sc.shape, -jnp.inf, m_sc.dtype)
        l_sc[...] = jnp.zeros(l_sc.shape, l_sc.dtype)
        acc_sc[...] = jnp.zeros(acc_sc.shape, acc_sc.dtype)

    needs_mask = (kv_len % tk) != 0        # only traced when Sk % tk != 0
    if needs_mask:
        col = kv * tk + lax.broadcasted_iota(jnp.int32, (1, tk), 1)
        col_valid = col < kv_len

    for h in range(n_head):                # static unroll over heads
        lo = h * dk
        qh = q_ref[:, lo:lo + dk] * scale  # 1/sqrt(dk) folded into Q (bf16)
        kh = k_ref[:, lo:lo + dk]
        vh = v_ref[:, lo:lo + dk]
        # QK^T: contract d_k directly (no transposed K copy); f32 accumulate.
        s = lax.dot_general(qh, kh, (((1,), (1,)), ((), ())),
                            preferred_element_type=jnp.float32)       # (tq, tk)
        if needs_mask:
            s = jnp.where(col_valid, s, -jnp.inf)

        m_prev = m_sc[h]                                               # (tq, 1)
        m_new = jnp.maximum(m_prev, jnp.max(s, axis=-1, keepdims=True))
        alpha = jnp.exp(m_prev - m_new)
        p = jnp.exp(s - m_new)                                         # unnormalized
        l_sc[h] = alpha * l_sc[h] + jnp.sum(p, axis=-1, keepdims=True)
        acc_sc[h] = alpha * acc_sc[h] + jnp.dot(
            p.astype(vh.dtype), vh, preferred_element_type=jnp.float32)
        m_sc[h] = m_new

    @pl.when(kv == pl.num_programs(2) - 1)
    def _finalize():
        # Deferred softmax normalization on the (tq, dk) accumulator only.
        for h in range(n_head):
            lo = h * dk
            inv_l = pl.reciprocal(l_sc[h], approx=True)                # (tq, 1)
            o_ref[:, lo:lo + dk] = (acc_sc[h] * inv_l).astype(o_ref.dtype)


def pallas_attention(k_arr, v_arr, q_arr, *, n_head, stacked, tq=256, tk=512):
    """Multi-head softmax attention.

    stacked=True : k_arr is the fused projection (3, B, S, D) = [K, V, Q];
                   v_arr / q_arr must be the same array (indexed by BlockSpec).
    stacked=False: k_arr/v_arr: (B, Sk, D), q_arr: (B, Sq, D).
    Returns (B, Sq, D).
    """
    if stacked:
        _, B, Sk, D = k_arr.shape
        Sq = Sk
    else:
        B, Sk, D = k_arr.shape
        Bq, Sq, Dq = q_arr.shape
        assert (B, D) == (Bq, Dq) and v_arr.shape == k_arr.shape
    assert D % n_head == 0
    dk = D // n_head
    scale = 1.0 / math.sqrt(dk)
    out_dtype = q_arr.dtype

    tq = min(tq, Sq)
    tk = min(tk, Sk)
    # v7x has 2 TensorCores: make sure a "parallel" axis has extent >= 2.
    if B * pl.cdiv(Sq, tq) < 2 and Sq >= 16:
        tq = max(8, _round_up(Sq // 2, 8))
    grid = (B, pl.cdiv(Sq, tq), pl.cdiv(Sk, tk))

    if stacked:
        k_spec = pl.BlockSpec((None, None, tk, D), lambda b, i, kv: (0, b, kv, 0))
        v_spec = pl.BlockSpec((None, None, tk, D), lambda b, i, kv: (1, b, kv, 0))
        q_spec = pl.BlockSpec((None, None, tq, D), lambda b, i, kv: (2, b, i, 0))
    else:
        k_spec = pl.BlockSpec((None, tk, D), lambda b, i, kv: (b, kv, 0))
        v_spec = pl.BlockSpec((None, tk, D), lambda b, i, kv: (b, kv, 0))
        q_spec = pl.BlockSpec((None, tq, D), lambda b, i, kv: (b, i, 0))
    out_spec = pl.BlockSpec((None, tq, D), lambda b, i, kv: (b, i, 0))

    item_in = k_arr.dtype.itemsize
    est = (2 * (2 * tk * D + tq * D) * item_in                         # K/V/Q (dbl-buf)
           + 2 * tq * D * jnp.dtype(out_dtype).itemsize                # output block
           + n_head * _round_up(tq, 8) * (2 * 128 + _round_up(dk, 128)) * 4  # m/l/acc
           + 4 * _round_up(tq, 8) * _round_up(tk, 128) * 4)            # softmax temps

    kernel = functools.partial(_flash_attn_kernel, n_head=n_head, dk=dk,
                               scale=scale, kv_len=Sk)
    return pl.pallas_call(
        kernel,
        out_shape=jax.ShapeDtypeStruct((B, Sq, D), out_dtype),
        grid=grid,
        in_specs=[k_spec, v_spec, q_spec],
        out_specs=out_spec,
        scratch_shapes=[
            pltpu.VMEM((n_head, tq, 1), jnp.float32),    # running max
            pltpu.VMEM((n_head, tq, 1), jnp.float32),    # running denominator
            pltpu.VMEM((n_head, tq, dk), jnp.float32),   # unnormalized P@V acc
        ],
        compiler_params=pltpu.CompilerParams(
            dimension_semantics=("parallel", "parallel", "arbitrary"),
            vmem_limit_bytes=_vmem_limit(est)),
        cost_estimate=pl.CostEstimate(
            flops=4 * B * n_head * Sq * Sk * dk,
            transcendentals=B * n_head * Sq * Sk,
            bytes_accessed=((2 * B * Sk * D + B * Sq * D) * item_in
                            + B * Sq * D * jnp.dtype(out_dtype).itemsize)),
    )(k_arr, v_arr, q_arr)


# ---------------------------------------------------------------------------
# MultiHeadAttention forward (glue in plain JAX, compute in Pallas)
# ---------------------------------------------------------------------------

def mha_forward(params, query, key, value, *, n_head):
    B, Sq, D = query.shape
    assert D % n_head == 0, "dim must be divisible by n_head"

    if (query is key) and (key is value):
        # Self-attention: fused K/V/Q projection; activations read from HBM once.
        kvq = pallas_fused_qkv(query.reshape(B * Sq, D),
                               params["w_kvq_t"], params["b_kvq"],
                               out_dtype=jnp.bfloat16)                # (3, N, D)
        kvq = kvq.reshape(3, B, Sq, D)
        attn_out = pallas_attention(kvq, kvq, kvq, n_head=n_head, stacked=True)
    else:
        # Cross-attention: separate projections, no stacked HBM round trip.
        Bk, Sk, Dk = key.shape
        assert key.shape == value.shape and (Bk, Dk) == (B, D)
        k_p = pallas_linear(key.reshape(Bk * Sk, D), params["wk_t"], params["bk"],
                            out_dtype=jnp.bfloat16).reshape(Bk, Sk, D)
        v_p = pallas_linear(value.reshape(Bk * Sk, D), params["wv_t"], params["bv"],
                            out_dtype=jnp.bfloat16).reshape(Bk, Sk, D)
        q_p = pallas_linear(query.reshape(B * Sq, D), params["wq_t"], params["bq"],
                            out_dtype=jnp.bfloat16).reshape(B, Sq, D)
        attn_out = pallas_attention(k_p, v_p, q_p, n_head=n_head, stacked=False)

    # attn_dropout / resid_dropout are no-ops with p = 0.0.
    out = pallas_linear(attn_out.reshape(B * Sq, D), params["wp_t"], params["bp"],
                        out_dtype=query.dtype)
    return out.reshape(B, Sq, D)


def init_params(key, dim):
    """Deterministic init mimicking nn.Linear default (U(-1/sqrt(dim), 1/sqrt(dim)))."""
    bound = 1.0 / math.sqrt(dim)
    names = ["wk_t", "bk", "wv_t", "bv", "wq_t", "bq", "wp_t", "bp"]
    keys = jax.random.split(key, len(names))
    params = {}
    for name, k in zip(names, keys):
        shape = (dim, dim) if name.startswith("w") else (dim,)
        params[name] = jax.random.uniform(
            k, shape, dtype=jnp.float32, minval=-bound, maxval=bound)
    # Pre-stacked weights/biases for the fused K/V/Q projection (done once here,
    # not per forward pass).
    params["w_kvq_t"] = jnp.stack(
        [params["wk_t"], params["wv_t"], params["wq_t"]], axis=0)     # (3, D, D)
    params["b_kvq"] = jnp.stack(
        [params["bk"], params["bv"], params["bq"]], axis=0)           # (3, D)
    return params


# ---------------------------------------------------------------------------
# Pure-JAX reference (f32) for sanity checking
# ---------------------------------------------------------------------------

def mha_reference(params, query, key, value, *, n_head):
    B, S, D = query.shape
    dk = D // n_head

    def lin(x, w_t, b):
        return x @ w_t + b

    k_p = lin(key, params["wk_t"], params["bk"])
    v_p = lin(value, params["wv_t"], params["bv"])
    q_p = lin(query, params["wq_t"], params["bq"])

    def to_heads(x):
        return x.reshape(B, -1, n_head, dk).transpose(0, 2, 1, 3)

    q4, k4, v4 = to_heads(q_p), to_heads(k_p), to_heads(v_p)
    s = jnp.einsum("bhqd,bhkd->bhqk", q4, k4) / math.sqrt(dk)
    p = jax.nn.softmax(s, axis=-1)
    o4 = jnp.einsum("bhqk,bhkd->bhqd", p, v4)
    o = o4.transpose(0, 2, 1, 3).reshape(B, S, D)
    return lin(o, params["wp_t"], params["bp"])


# ---------------------------------------------------------------------------

if __name__ == "__main__":
    B, S, dim, n_head = 2, 8, 32, 4

    root = jax.random.PRNGKey(0)
    k_params, k_x, k_q, k_kv = jax.random.split(root, 4)
    params = init_params(k_params, dim)

    # 1) Self-attention (typical neuralformer encoder usage) — fused QKV path.
    x = jax.random.normal(k_x, (B, S, dim), dtype=jnp.float32)
    out_self = jax.block_until_ready(mha_forward(params, x, x, x, n_head=n_head))
    ref_self = mha_reference(params, x, x, x, n_head=n_head)
    assert out_self.shape == (B, S, dim)
    # bf16 MXU operands (f32 accumulation) -> loosened tolerance vs f32 reference.
    assert jnp.allclose(out_self, ref_self, atol=1e-1, rtol=1e-1), \
        "self-attention mismatch vs reference"
    assert float(jnp.mean(jnp.abs(out_self - ref_self))) < 2.5e-2, \
        "self-attention mean error too large"

    # 2) Distinct q / k / v inputs — separate-projection path.
    q_in = jax.random.normal(k_q, (B, S, dim), dtype=jnp.float32)
    kv_in = jax.random.normal(k_kv, (B, S, dim), dtype=jnp.float32)
    out_cross = jax.block_until_ready(
        mha_forward(params, q_in, kv_in, kv_in, n_head=n_head))
    ref_cross = mha_reference(params, q_in, kv_in, kv_in, n_head=n_head)
    assert jnp.allclose(out_cross, ref_cross, atol=1e-1, rtol=1e-1), \
        "cross-attention mismatch vs reference"
    assert float(jnp.mean(jnp.abs(out_cross - ref_cross))) < 2.5e-2, \
        "cross-attention mean error too large"

    print("KERNEL_OK")
</pallas_src>

<mosaic_0001>
module attributes {stable_mosaic.version = 11 : i64} {
  func.func @_linear_kernel(%arg0: i32, %arg1: i32, %arg2: i32, %arg3: memref<16x32xf32, #tpu.memory_space<vmem>>, %arg4: memref<1x32x32xf32, #tpu.memory_space<vmem>>, %arg5: memref<1x1x32xf32, #tpu.memory_space<vmem>>, %arg6: memref<1x16x32xbf16, #tpu.memory_space<vmem>>) attributes {dimension_semantics = [#tpu.dimension_semantics<parallel>, #tpu.dimension_semantics<parallel>, #tpu.dimension_semantics<arbitrary>], iteration_bounds = array<i64: 1, 1, 3>, scalar_prefetch = 0 : i64, scratch_operands = 0 : i64, tpu.core_type = #tpu.core_type<tc>, window_params = [{transform_indices = @transform_0, window_bounds = array<i64: 16, 32>}, {transform_indices = @transform_1, window_bounds = array<i64: 1, 32, 32>}, {transform_indices = @transform_2, window_bounds = array<i64: 1, 1, 32>}, {transform_indices = @transform_3, window_bounds = array<i64: 1, 16, 32>}]} {
    %c0 = arith.constant 0 : index
    %c0_0 = arith.constant 0 : index
    %0 = vector.load %arg3[%c0, %c0_0] : memref<16x32xf32, #tpu.memory_space<vmem>>, vector<16x32xf32>
    %1 = arith.truncf %0 : vector<16x32xf32> to vector<16x32xbf16>
    %c0_1 = arith.constant 0 : index
    %c0_2 = arith.constant 0 : index
    %c0_3 = arith.constant 0 : index
    %2 = vector.load %arg4[%c0_1, %c0_2, %c0_3] : memref<1x32x32xf32, #tpu.memory_space<vmem>>, vector<1x32x32xf32>
    %3 = vector.shape_cast %2 : vector<1x32x32xf32> to vector<32x32xf32>
    %4 = arith.truncf %3 : vector<32x32xf32> to vector<32x32xbf16>
    %cst = arith.constant dense<0.000000e+00> : vector<16x32xf32>
    %5 = tpu.matmul %1, %4, %cst {dimension_numbers = #tpu.dot_dimension_numbers<[1], [0], [0], [1], [0, 0, 1, 1], [], []>} : vector<16x32xbf16>, vector<32x32xbf16>, vector<16x32xf32> -> vector<16x32xf32>
    %c0_4 = arith.constant 0 : index
    %c0_5 = arith.constant 0 : index
    %c0_6 = arith.constant 0 : index
    %6 = vector.load %arg5[%c0_4, %c0_5, %c0_6] : memref<1x1x32xf32, #tpu.memory_space<vmem>>, vector<1x1x32xf32>
    %7 = vector.shape_cast %6 : vector<1x1x32xf32> to vector<1x32xf32>
    %8 = vector.broadcast %7 : vector<1x32xf32> to vector<16x32xf32>
    %9 = arith.addf %5, %8 : vector<16x32xf32>
    %10 = arith.truncf %9 : vector<16x32xf32> to vector<16x32xbf16>
    %c0_7 = arith.constant 0 : index
    %c0_8 = arith.constant 0 : index
    %c0_9 = arith.constant 0 : index
    %11 = vector.load %arg6[%c0_7, %c0_8, %c0_9] : memref<1x16x32xbf16, #tpu.memory_space<vmem>>, vector<1x16x32xbf16>
    %12 = vector.shape_cast %11 : vector<1x16x32xbf16> to vector<16x32xbf16>
    %13 = vector.shape_cast %10 : vector<16x32xbf16> to vector<1x16x32xbf16>
    tpu.vector_store %arg6[%c0_7, %c0_8, %c0_9], %13 {strides = array<i32>} : memref<1x16x32xbf16, #tpu.memory_space<vmem>>, vector<1x16x32xbf16>,
    return
  }
  func.func @transform_0(%arg0: i32, %arg1: i32, %arg2: i32) -> (i32, i32) {
    %c0_i32 = arith.constant 0 : i32
    %c0_i32_0 = arith.constant 0 : i32
    return %arg0, %c0_i32 : i32, i32
  }
  func.func @transform_1(%arg0: i32, %arg1: i32, %arg2: i32) -> (i32, i32, i32) {
    %c0_i32 = arith.constant 0 : i32
    %c0_i32_0 = arith.constant 0 : i32
    return %arg2, %c0_i32, %arg1 : i32, i32, i32
  }
  func.func @transform_2(%arg0: i32, %arg1: i32, %arg2: i32) -> (i32, i32, i32) {
    %c0_i32 = arith.constant 0 : i32
    %c0_i32_0 = arith.constant 0 : i32
    return %arg2, %c0_i32, %arg1 : i32, i32, i32
  }
  func.func @transform_3(%arg0: i32, %arg1: i32, %arg2: i32) -> (i32, i32, i32) {
    %c0_i32 = arith.constant 0 : i32
    return %arg2, %arg0, %arg1 : i32, i32, i32
  }
}

</mosaic_0001>

<bundles_post_ra>
// kernel: tpu_custom_call.1
= control target key start
LH: loop header
LB: loop body
LE: loop exit
PB: predicated region body
PF: predicated region fallthrough
CT: control target
= control target key end

     0   :  { %8 = vsyncpa [#allocation3], 0  ;;  %s990_s0 = inlined_call_operand.hbm [shape: f32[16,32], index: 0, kind: input, shape index: {}]   ;;  %s991_s1 = inlined_call_operand.hbm [shape: f32[3,32,32], index: 1, kind: input, shape index: {}]   ;;  %s992_s2 = inlined_call_operand.vmem [shape: f32[3,1,32], index: 2, kind: input, shape index: {}]   ;;  %s993_s3 = inlined_call_operand.hbm [shape: bf16[3,16,32], index: 3, kind: output, shape index: {}]  }
   0x1   :  { %9 = vsyncpa [#allocation6], 0 }
   0x2   :  { %11 = vsyncpa [#allocation6 + $0x1], 0 }
   0x3   :  { %12 = vsyncpa [#allocation4], 0 }
   0x4   :  { %14 = vsyncpa [#allocation4 + $0x1], 0  ;;  %s761_s12 = smov 0   ;;  %s763_s13 = smov 0  }
   0x5   :  { %s765_s14 = smov 0   ;;  %s767_s15 = smov 0  }
   0x6   :  { %s769_s16 = smov 0   ;;  %s771_s17 = smov 0  }
   0x7 LB: > { %s471_s18 = sadd.s32 4294967295, %s730_s17   ;;  %s472_s19 = sadd.s32 4294967294, %s730_s17   ;;  %s730_s17 = sphi %s771_s17, %s20_s17   ;;  %s726_s16 = sphi %s769_s16, %s1016_s16   ;;  %s722_s15 = sphi %s767_s15, %s1015_s15   ;;  %s718_s14 = sphi %s765_s14, %s1014_s14   ;;  %s714_s13 = sphi %s763_s13, %s1013_s13   ;;  %s710_s12 = sphi %s761_s12, %s1012_s12  }
   0x8   : > { %p87_p0 = scmp.ne.s32.totalorder %s714_s13, %s710_s12  ;;  %p795_p1 = scmp.eq.s32.totalorder %s471_s18, 0 }
   0x9   : > { %p799_p2 = scmp.eq.s32.totalorder %s471_s18, 2  ;;  %p149_p3 = scmp.eq.s32.totalorder %s472_s19, 2 }
   0xa   : > { %s998_s20 = scalar_select %p795_p1, 1, 0 }
   0xb   : > { %s999_s21 = scalar_select %p799_p2, 1, 0 }
   0xc   : > { %p805_p4 = por %p795_p1, %p87_p0  ;;  %p473_p5 = scmp.ge.s32.totalorder %s730_s17, 1 }
   0xd   : > { %p810_p6 = por %p149_p3, %p87_p0  ;;  %p156_p7 = scmp.lt.s32.totalorder %s730_s17, 4 }
   0xe   : > { %s1000_s22 = scalar_select %p805_p4, 1, 0 }
   0xf   : > { %s1001_s23 = scalar_select %p810_p6, 1, 0 }
  0x10   : > { %p815_p8 = pnand %p473_p5, %p156_p7  ;;  %s732_s25 = smov [#allocation2]  }
  0x11   : > { %s171_s26 = sshll.u32 %s732_s25, 4  ;;  %s32_s28 = sadd.s32 1, %s726_s16  ;;  %s172_s26 = int_to_ptr.vmem [resolvable:$true] %s171_s26 }
  0x12   : > { %s1002_s24 = scalar_select %p815_p8, 1, 0 }
  0x13   : > { %p515_p9 = pneg %p815_p8  ;;  %s586_s4 = scalar_lea.hbm %s990_s0, 256 }
  0x14   : > { %p587_p11 = scmp.ne.s32.totalorder %s990_s0, %s586_s4  ;;  %p593_p3 = scmp.lt.u32.totalorder %s586_s4, %s990_s0 }
  0x15   : > { %p823_p10 = pnand %p515_p9, %p795_p1 }
  0x17   : > { %p588_p12 = pneg %p823_p10 }
  0x19   : > { %p589_p13 = pnand %p588_p12, %p587_p11 }
  0x1b   : > { %p590_p0 = pneg %p589_p13 }
  0x1d   : > { %p595_p5 = pnand %p593_p3, %p590_p0 }
  0x1f   : > { %598 = shalt.err (!%p595_p5)
}
  0x20   : > { %s599_s9 = scalar_lea.vmem %s172_s26, 256  ;;  %p607_p4 = scmp.lt.s32.totalorder %s172_s26, %s172_s26 }
  0x21   : > { %p600_p7 = scmp.ne.s32.totalorder %s172_s26, %s599_s9  ;;  %p608_p1 = scmp.lt.s32.totalorder %s599_s9, %s599_s9 }
  0x23   : > { %p602_p9 = pnand %p600_p7, %p588_p12  ;;  %p609_p8 = por %p608_p1, %p607_p4 }
  0x25   : > { %p603_p6 = pneg %p602_p9 }
  0x27   : > { %p610_p2 = pnand %p609_p8, %p603_p6 }
  0x29   : > { %613 = shalt.err (!%p610_p2)
}
  0x2a   : > { %s733_s10 = smov 128   ;;  %s734_s11 = smov 8  }
  0x2b   : > { %518 = dma.hbm_to_vmem [thread:$0]  (!%p823_p10), %s990_s0, 256, %s172_s26, [#allocation3], %s733_s10, %s733_s10, %s734_s11  }
  0x2c   : > { %p33_p1 = scmp.ge.s32.totalorder %s32_s28, 3  ;;  %s74_s25 = sadd.s32 1, %s718_s14 }
  0x2d   : > { %p81_p2 = scmp.ne.s32.totalorder %s718_s14, %s714_s13  ;;  %p82_p4 = scmp.eq.s32.totalorder %s730_s17, 0 }
  0x2e   : > { %s1018_s28 = smov (%p33_p1, %s32_s28), 0  ;;  %p1005_p8 = scmp.ne.s32.totalorder %s999_s21, 0 }
  0x2f   : > { %p853_p6 = por %p82_p4, %p81_p2  ;;  %s69_s30 = ssub.s32 %s726_s16, %s1018_s28 }
  0x30   : > { %p859_p11 = por %p1005_p8, %p81_p2  ;;  %p528_p12 = scmp.lt.s32.totalorder %s730_s17, 3 }
  0x31   : > { %p72_p10 = scmp.eq.s32.totalorder %s69_s30, 0  ;;  %s185_s26 = sand.u32 1, %s718_s14  }
  0x32   : > { %s476_s4 = sshll.u32 %s185_s26, 5  ;;  %s492_s6 = sshll.u32 %s726_s16, 9 }
  0x33   : > { %s868_s5 = scalar_select %p72_p10, %s718_s14, %s74_s25  }
  0x34   : > { %s874_s9 = scalar_lea.hbm %s991_s1, %s492_s6  ;;  %s189_s21 = scalar_lea.vmem [#allocation5], %s476_s4 }
  0x35   : > { %s197_s18 = sshll.u32 %s189_s21, 4  ;;  %p880_p13 = pnand %p528_p12, %p853_p6  ;;  %s876_s18 = int_to_ptr.vmem [resolvable:$true] %s197_s18 }
  0x36   : > { %s884_s25 = scalar_lea.sflag [#allocation6], %s185_s26  ;;  %s614_s30 = scalar_lea.hbm %s874_s9, 512 }
  0x37   : > { %p615_p0 = scmp.ne.s32.totalorder %s874_s9, %s614_s30  ;;  %p616_p3 = pneg %p880_p13 }
  0x38   : > { %s619_s29 = scalar_lea.hbm %s991_s1, 1536  ;;  %p620_p9 = scmp.lt.u32.totalorder %s874_s9, %s991_s1 }
  0x39   : > { %p617_p5 = pnand %p616_p3, %p615_p0  ;;  %p621_p1 = scmp.lt.u32.totalorder %s619_s29, %s614_s30 }
  0x3a   : > { %p623_p4 = scmp.lt.u32.totalorder %s614_s30, %s874_s9 }
  0x3b   : > { %p618_p7 = pneg %p617_p5  ;;  %p622_p2 = por %p621_p1, %p620_p9 }
  0x3d   : > { %p624_p6 = por %p623_p4, %p622_p2 }
  0x3f   : > { %p625_p8 = pnand %p624_p6, %p618_p7 }
  0x41   : > { %628 = shalt.err (!%p625_p8)
}
  0x42   : > { %s629_s26 = scalar_lea.vmem %s876_s18, 512  ;;  %s735_s21 = smov [#allocation5]  }
  0x43   : > { %p630_p12 = scmp.ne.s32.totalorder %s876_s18, %s629_s26  ;;  %s634_s4 = sshll.u32 %s735_s21, 4  ;;  %s635_s4 = int_to_ptr.vmem [resolvable:$false] %s634_s4 }
  0x44   : > { %s636_s6 = scalar_lea.vmem %s635_s4, 1024  ;;  %p637_p5 = scmp.lt.s32.totalorder %s876_s18, %s635_s4 }
  0x45   : > { %p632_p10 = pnand %p630_p12, %p616_p3  ;;  %p638_p9 = scmp.lt.s32.totalorder %s636_s6, %s629_s26 }
  0x47   : > { %p633_p0 = pneg %p632_p10  ;;  %p639_p1 = por %p638_p9, %p637_p5 }
  0x49   : > { %p640_p2 = pnand %p639_p1, %p633_p0 }
  0x4b   : > { %643 = shalt.err (!%p640_p2)
}
  0x4c   : > { %522 = dma.hbm_to_vmem [thread:$0]  (!%p880_p13), %s874_s9, 512, %s876_s18, %s884_s25, %s733_s10, %s733_s10, %s734_s11  }
  0x4d   : > { %p1008_p3 = scmp.ne.s32.totalorder %s1002_s24, 0 }
  0x4e   : > { %p1009_p7 = scmp.ne.s32.totalorder (!%p1008_p3), %s998_s20, 0 }
  0x4f   : > { %218 = sbr.rel (%p1008_p3) target bundleno = 334 (0x14e), region = 32 }
  0x56   : > { %697 = dma.done.wait (%p1009_p7), [#allocation3], 256  }
  0x57   : > { %699 = vsyncadd (%p1009_p7), [#allocation3], 4294967040  ;;  %s922_s30 = sand.u32 1, %s714_s13   ;;  %p1010_p4 = scmp.ne.s32.totalorder %s1000_s22, 0 }
  0x58   : > { %s481_s19 = sshll.u32 %s922_s30, 5  ;;  %s225_s29 = scalar_lea.sflag [#allocation6], %s922_s30 }
  0x59   : > { %s228_s7 = scalar_lea.vmem [#allocation5], %s481_s19 }
  0x5a   : > { %701 = dma.done.wait (%p1010_p4), %s225_s29, 512  }
  0x5b   : > { %703 = vsyncadd (%p1010_p4), %s225_s29, 4294966784  ;;  %v736_v0 = vmov 0.0   ;;  %vm737_vm0 = vmmov 0   ;;  %v269_v1 = vld [vmem:[%s228_s7] sm:$0xff]  ;;  %v270_v2 = vld [vmem:[%s228_s7 + $0x8] sm:$0xff]  ;;  %vm282_vm1 = vcmask 261120  }
  0x5c   : > { %499 = vmatprep.subr.bf16.mxu0 %v736_v0  ;;  %503 = vmatprep.mubr.msk.bf16.mxu0 %vm737_vm0, %v736_v0  ;;  %v271_v3 = vld [vmem:[%s228_s7 + $0x10] sm:$0xff]  ;;  %v273_v4 = vpack.c.bf16 %v270_v2, %v269_v1  ;;  %v272_v5 = vld [vmem:[%s228_s7 + $0x18] sm:$0xff]  ;;  %p258_p13 = scmp.lt.s32.totalorder %s722_s15, 2  ;;  %s482_s22 = sshll.u32 %s922_s30, 3  ;;  %vm335_vm2 = vcmask 257024  }
  0x5d   : > { %v274_v6 = vpack.c.bf16 %v272_v5, %v271_v3  ;;  %v266_v7 = vld [vmem:[#allocation2] sm:$0xff]  ;;  %v267_v8 = vld [vmem:[#allocation2 + $0x8] sm:$0xff]  ;;  %s256_s9 = scalar_lea.vmem [#allocation7], %s482_s22  ;;  %s495_s25 = sshll.u32 %s722_s15, 7 }
  0x5e   : > { %500 = vmatpush3.bf16.msra.mxu0 %v273_v4  ;;  %v268_v9 = vpack.c.bf16 %v267_v8, %v266_v7  ;;  %s259_s20 = scalar_select %p258_p13, %s722_s15, 2 }
  0x5f   : > { %501 = vmatprep.subr.bf16.mxu0 %v736_v0  ;;  %s355_s18 = sshll.u32 %s256_s9, 4  ;;  %s940_s21 = scalar_lea.hbm %s993_s3, %s495_s25  ;;  %s942_s18 = int_to_ptr.vmem [resolvable:$true] %s355_s18 }
  0x60   : > { %s263_s11 = scalar_lea.vmem %s992_s2, %s259_s20  ;;  %s339_s4 = scalar_lea.sflag [#allocation4], %s922_s30 }
  0x61   : > { %v483_v10 = vld [vmem:[%s263_s11] ss:$0 sm:$0xff]  ;;  %s644_s15 = scalar_lea.vmem %s942_s18, 128  ;;  %s738_s6 = smov [#allocation7]  }
  0x62   : > { %502 = vmatpush3.bf16.msra.mxu0 %v274_v6  ;;  %p645_p6 = scmp.ne.s32.totalorder %s942_s18, %s644_s15  ;;  %s648_s19 = sshll.u32 %s738_s6, 4  ;;  %s649_s19 = int_to_ptr.vmem [resolvable:$false] %s648_s19 }
  0x63   : > { %s650_s29 = scalar_lea.vmem %s649_s19, 256  ;;  %p651_p10 = scmp.lt.s32.totalorder %s942_s18, %s649_s19 }
  0x64   : > { %p646_p8 = pnand %p645_p6, %p859_p11  ;;  %p652_p0 = scmp.lt.s32.totalorder %s650_s29, %s644_s15 }
  0x65   : > { %504 = vmatmul.mubr.msk.bf16.vlgmr.msra.gmra.mrb[0].mxu0 %vm282_vm1, %v268_v9 }
  0x66   : > { %p647_p12 = pneg %p646_p8  ;;  %p653_p5 = por %p652_p0, %p651_p10 }
  0x68   : > { %p654_p9 = pnand %p653_p5, %p647_p12 }
 0x138   : > { %v320_v11 = vpop.f32.mrb[0].mxu0 }
 0x139   : > { %v321_v12 = vadd.f32 %v483_v10, %v320_v11  ;;  %v505_v13 = vpop.f32.mrb[1].mxu0 }
 0x13a   : > { %v323_v14 = vpop.f32.mrb[2].mxu0 }
 0x13b   : > { %v493_v15 = vpack.c.bf16 %v321_v12, %v321_v12  ;;  %v324_v16 = vadd.f32 %v483_v10, %v323_v14  ;;  %v506_v17 = vpop.f32.mrb[3].mxu0 }
 0x13d   : > { %336 = vst.msk [vmem:[%s256_s9] sm:$0xf] %vm335_vm2, %v493_v15  ;;  %v494_v18 = vpack.c.bf16 %v324_v16, %v324_v16 }
 0x13f   : > { %337 = vst.msk [vmem:[%s256_s9 + $0x4] sm:$0xf] %vm335_vm2, %v494_v18 }
 0x140   : > { %657 = shalt.err (!%p654_p9)
}
 0x141   : > { %s658_s7 = scalar_lea.hbm %s940_s21, 128  ;;  %s662_s24 = scalar_lea.hbm %s993_s3, 384 }
 0x142   : > { %p659_p1 = scmp.ne.s32.totalorder %s940_s21, %s658_s7  ;;  %p663_p7 = scmp.lt.u32.totalorder %s940_s21, %s993_s3 }
 0x143   : > { %p664_p4 = scmp.lt.u32.totalorder %s662_s24, %s658_s7  ;;  %p666_p6 = scmp.lt.u32.totalorder %s658_s7, %s940_s21 }
 0x144   : > { %p660_p2 = pnand %p659_p1, %p859_p11 }
 0x145   : > { %p665_p13 = por %p664_p4, %p663_p7 }
 0x146   : > { %p661_p3 = pneg %p660_p2 }
 0x147   : > { %p667_p8 = por %p666_p6, %p665_p13 }
 0x149   : > { %p668_p12 = pnand %p667_p8, %p661_p3 }
 0x14b   : > { %671 = shalt.err (!%p668_p12)
}
 0x14c   : > { %s739_s9 = smov 64   ;;  %s740_s25 = smov 4  }
 0x14d   : > { %513 = dma.vmem_to_hbm [thread:$0]  (%p859_p11), %s942_s18, 128, %s940_s21, %s339_s4, %s739_s9, %s739_s9, %s740_s25  }
 0x14e PF: > { %p530_p10 = scmp.ge.s32.totalorder %s730_s17, 2  ;;  %s370_s8 = sand.u32 1, %s710_s12  }
 0x14f   : > { %p1011_p0 = scmp.ne.s32.totalorder %s1001_s23, 0  ;;  %s371_s26 = scalar_lea.sflag [#allocation4], %s370_s8 }
 0x151   : > { %p524_p5 = pnand %p530_p10, %p1011_p0 }
 0x153   : > { %705 = dma.done.wait (!%p524_p5), %s371_s26, 128  }
 0x154   : > { %707 = vsyncadd (!%p524_p5), %s371_s26, 4294967168  ;;  %s20_s17 = sadd.s32 1, %s730_s17   ;;  %s1012_s12 = smov %s714_s13 }
 0x155   : > { %p17_p9 = scmp.ge.s32.totalorder %s20_s17, 5   ;;  %s1013_s13 = smov %s718_s14 }
 0x156   : > { %s1014_s14 = smov %s868_s5  ;;  %s1015_s15 = smov %s726_s16 }
 0x157   : > { %s1016_s16 = smov %s1018_s28  ;;  %19 = sbr.rel (!%p17_p9) target bundleno = 7 (0x7), region = 86 }
 0x15e   :  { %376 = vsyncpa [#allocation3], 1 }
 0x15f   :  { %378 = vsyncpa [#allocation3 + $0x1], 1 }
 0x160   :  { %379 = vsyncpa [#allocation6], 1 }
 0x161   :  { %381 = vsyncpa [#allocation6 + $0x1], 1 }
 0x162   :  { %382 = vsyncpa [#allocation4], 1 }
 0x163   :  { %384 = vsyncpa [#allocation4 + $0x1], 1 }

</bundles_post_ra>
